<compile_context>
chip_gen: v7x
topology: tpu7x:2x2x1
jax: 0.10.0
libtpu: 0.0.40
codegen_flags: <defaults>
</compile_context>

<pallas_src>
import functools

import jax
import jax.numpy as jnp
from jax.experimental import pallas as pl
from jax.experimental.pallas import tpu as pltpu


def _round_up(x, m):
    return ((x + m - 1) // m) * m


def _dense_kernel(x_ref, w_ref, b_ref, o_ref, acc_ref):
    """One (tm, tn) output tile, accumulated over the K grid axis.

    x_ref:   (tm, tk)  activation tile
    w_ref:   (tk, tn)  weight tile, already transposed to (K, N) layout
    b_ref:   (1, tn)   bias tile (f32)
    o_ref:   (tm, tn)  output tile
    acc_ref: (tm, tn)  f32 accumulator scratch, persists across the K axis
    """
    k = pl.program_id(2)

    # Plain row-major MXU matmul with f32 accumulation.
    prod = jnp.dot(x_ref[...], w_ref[...], preferred_element_type=jnp.float32)

    @pl.when(k == 0)
    def _():
        acc_ref[...] = prod            # init with first product (no zero-fill RMW)

    @pl.when(k > 0)
    def _():
        acc_ref[...] += prod

    # Finalize only once, on the last K step: bias add + dtype cast.
    @pl.when(k == pl.num_programs(2) - 1)
    def _():
        o_ref[...] = (acc_ref[...] + b_ref[...]).astype(o_ref.dtype)


def _choose_tiles(M, N, K, in_dtype):
    """Generation-safe tile plan (fits v5e 16 MiB scoped VMEM and v7x 64 MiB)."""
    m_align = 16 if in_dtype == jnp.bfloat16 else 8   # bf16 packs 2 rows/sublane

    # M (sublanes): keep the whole batch resident when it fits one tile, so the
    # weight is read from HBM exactly once (skinny-M / inference optimum).
    M_pad = _round_up(M, m_align)
    if M_pad <= 512:
        tm = M_pad
    else:
        tm = 512
        M_pad = _round_up(M, tm)

    # N (lanes): multiple of 128 for unmasked, lane-dense output stores.
    N_pad = _round_up(N, 128)
    tn = next(c for c in (512, 256, 128) if N_pad % c == 0)

    # K (reduction): multiple of 128; the only axis that *needs* zero padding.
    K_pad = _round_up(K, 128)
    tk = next(c for c in (512, 256, 128) if K_pad % c == 0)

    # v7x has 2 TensorCores: make sure at least one parallel axis has >1 block
    # when possible (harmless no-op on single-TC v5e/v6e).
    if (M_pad // tm) == 1 and (N_pad // tn) == 1 and tn >= 256:
        tn //= 2

    return tm, tn, tk, M_pad, N_pad, K_pad


def dense_forward(x, weight, bias, *, use_bf16_inputs=True):
    """Pallas implementation of nn.Linear(input_dim, output_dim) forward.

    Args:
      x:      (batch, input_dim)        float32
      weight: (output_dim, input_dim)   float32  (PyTorch layout)
      bias:   (output_dim,)             float32
      use_bf16_inputs: cast x / weight to bf16 at the kernel boundary
        (f32 accumulation on the MXU).  Default True — this is the fast path
        on all TPU generations.  Set False for bit-exact f32 results.
    Returns:
      (batch, output_dim) with x.dtype
    """
    M, K = x.shape
    N, K_w = weight.shape
    assert K == K_w, "weight inner dim must match x inner dim"
    out_dtype = x.dtype
    in_dtype = jnp.bfloat16 if use_bf16_inputs else x.dtype

    tm, tn, tk, M_pad, N_pad, K_pad = _choose_tiles(M, N, K, in_dtype)

    x_c = x.astype(in_dtype)
    # One-time transpose of the (static) weight to (K, N) layout so the kernel
    # contraction is a standard row-major matmul (no per-step XLU transpose).
    # TODO(synk): for a real deployment, pre-cast / pre-transpose / pre-pad the
    # static weight outside the per-call path.
    w_t = weight.astype(in_dtype).T

    # Minimal padding: K must be zero-padded (feeds the reduction); M / N pads
    # only add rows/cols that are sliced off below.  Skip pads when aligned.
    if (M_pad, K_pad) != (M, K):
        x_c = jnp.pad(x_c, ((0, M_pad - M), (0, K_pad - K)))
    if (K_pad, N_pad) != (K, N):
        w_t = jnp.pad(w_t, ((0, K_pad - K), (0, N_pad - N)))
    b_p = bias.astype(jnp.float32)
    if N_pad != N:
        b_p = jnp.pad(b_p, (0, N_pad - N))
    b_p = b_p.reshape(1, N_pad)

    grid = (M_pad // tm, N_pad // tn, K_pad // tk)

    out_padded = pl.pallas_call(
        _dense_kernel,
        out_shape=jax.ShapeDtypeStruct((M_pad, N_pad), out_dtype),
        grid_spec=pltpu.PrefetchScalarGridSpec(
            num_scalar_prefetch=0,
            grid=grid,
            in_specs=[
                pl.BlockSpec((tm, tk), lambda i, j, k: (i, k)),   # x tile
                pl.BlockSpec((tk, tn), lambda i, j, k: (k, j)),   # W.T tile
                pl.BlockSpec((1, tn), lambda i, j, k: (0, j)),    # bias tile
            ],
            out_specs=pl.BlockSpec((tm, tn), lambda i, j, k: (i, j)),
            scratch_shapes=[pltpu.VMEM((tm, tn), jnp.float32)],
        ),
        compiler_params=pltpu.CompilerParams(
            dimension_semantics=("parallel", "parallel", "arbitrary"),
        ),
    )(x_c, w_t, b_p)

    if (M_pad, N_pad) != (M, N):
        out_padded = out_padded[:M, :N]
    return out_padded


if __name__ == "__main__":
    # Small shapes consistent with Dense(input_dim, output_dim).
    batch, input_dim, output_dim = 8, 32, 64

    key = jax.random.PRNGKey(0)
    kx, kw, kb = jax.random.split(key, 3)

    # Deterministic parameter init mimicking nn.Linear's default
    # (uniform in [-1/sqrt(input_dim), 1/sqrt(input_dim)]).
    bound = 1.0 / jnp.sqrt(jnp.float32(input_dim))
    weight = jax.random.uniform(
        kw, (output_dim, input_dim), jnp.float32, minval=-bound, maxval=bound
    )
    bias = jax.random.uniform(
        kb, (output_dim,), jnp.float32, minval=-bound, maxval=bound
    )
    x = jax.random.normal(kx, (batch, input_dim), jnp.float32)

    fwd = jax.jit(dense_forward, static_argnames="use_bf16_inputs")

    # Reference (same math as PyTorch Linear forward).
    ref = x @ weight.T + bias

    # 1) Default fast path: bf16 operands, f32 accumulation.
    out_bf16 = jax.block_until_ready(fwd(x, weight, bias))
    assert out_bf16.shape == (batch, output_dim)
    assert out_bf16.dtype == x.dtype
    assert jnp.allclose(out_bf16, ref, atol=3e-2, rtol=3e-2)

    # 2) Bit-accurate f32 path.
    out_f32 = jax.block_until_ready(fwd(x, weight, bias, use_bf16_inputs=False))
    assert out_f32.shape == (batch, output_dim)
    assert jnp.allclose(out_f32, ref, atol=1e-5, rtol=1e-5)

    print("KERNEL_OK")
</pallas_src>

<mosaic_0001>
module attributes {stable_mosaic.version = 11 : i64} {
  func.func @_dense_kernel(%arg0: i32, %arg1: i32, %arg2: i32, %arg3: memref<16x128xbf16, #tpu.memory_space<vmem>>, %arg4: memref<128x128xbf16, #tpu.memory_space<vmem>>, %arg5: memref<1x128xf32, #tpu.memory_space<vmem>>, %arg6: memref<16x128xf32, #tpu.memory_space<vmem>>, %arg7: memref<16x128xf32, #tpu.memory_space<vmem>>) attributes {dimension_semantics = [#tpu.dimension_semantics<parallel>, #tpu.dimension_semantics<parallel>, #tpu.dimension_semantics<arbitrary>], iteration_bounds = array<i64: 1, 1, 1>, scalar_prefetch = 0 : i64, scratch_operands = 1 : i64, tpu.core_type = #tpu.core_type<tc>, window_params = [{transform_indices = @transform_0, window_bounds = array<i64: 16, 128>}, {transform_indices = @transform_1, window_bounds = array<i64: 128, 128>}, {transform_indices = @transform_2, window_bounds = array<i64: 1, 128>}, {transform_indices = @transform_3, window_bounds = array<i64: 16, 128>}]} {
    %c0 = arith.constant 0 : index
    %c0_0 = arith.constant 0 : index
    %0 = vector.load %arg3[%c0, %c0_0] : memref<16x128xbf16, #tpu.memory_space<vmem>>, vector<16x128xbf16>
    %c0_1 = arith.constant 0 : index
    %c0_2 = arith.constant 0 : index
    %1 = vector.load %arg4[%c0_1, %c0_2] : memref<128x128xbf16, #tpu.memory_space<vmem>>, vector<128x128xbf16>
    %cst = arith.constant dense<0.000000e+00> : vector<16x128xf32>
    %2 = tpu.matmul %0, %1, %cst {dimension_numbers = #tpu.dot_dimension_numbers<[1], [0], [0], [1], [0, 0, 1, 1], [], []>} : vector<16x128xbf16>, vector<128x128xbf16>, vector<16x128xf32> -> vector<16x128xf32>
    %c0_i32 = arith.constant 0 : i32
    %3 = arith.cmpi eq, %arg2, %c0_i32 : i32
    %4 = arith.extui %3 : i1 to i32
    %c0_i32_3 = arith.constant 0 : i32
    %5 = arith.cmpi ne, %4, %c0_i32_3 : i32
    scf.if %5 {
      %c0_8 = arith.constant 0 : index
      %c0_9 = arith.constant 0 : index
      %12 = vector.load %arg7[%c0_8, %c0_9] : memref<16x128xf32, #tpu.memory_space<vmem>>, vector<16x128xf32>
      tpu.vector_store %arg7[%c0_8, %c0_9], %2 {strides = array<i32>} : memref<16x128xf32, #tpu.memory_space<vmem>>, vector<16x128xf32>,
    } else {
    }
    %c0_i32_4 = arith.constant 0 : i32
    %6 = arith.cmpi sgt, %arg2, %c0_i32_4 : i32
    %7 = arith.extui %6 : i1 to i32
    %c0_i32_5 = arith.constant 0 : i32
    %8 = arith.cmpi ne, %7, %c0_i32_5 : i32
    scf.if %8 {
      %c0_8 = arith.constant 0 : index
      %c0_9 = arith.constant 0 : index
      %12 = vector.load %arg7[%c0_8, %c0_9] : memref<16x128xf32, #tpu.memory_space<vmem>>, vector<16x128xf32>
      %13 = arith.addf %12, %2 : vector<16x128xf32>
      %c0_10 = arith.constant 0 : index
      %c0_11 = arith.constant 0 : index
      %14 = vector.load %arg7[%c0_10, %c0_11] : memref<16x128xf32, #tpu.memory_space<vmem>>, vector<16x128xf32>
      tpu.vector_store %arg7[%c0_10, %c0_11], %13 {strides = array<i32>} : memref<16x128xf32, #tpu.memory_space<vmem>>, vector<16x128xf32>,
    } else {
    }
    %c0_i32_6 = arith.constant 0 : i32
    %9 = arith.cmpi eq, %arg2, %c0_i32_6 : i32
    %10 = arith.extui %9 : i1 to i32
    %c0_i32_7 = arith.constant 0 : i32
    %11 = arith.cmpi ne, %10, %c0_i32_7 : i32
    scf.if %11 {
      %c0_8 = arith.constant 0 : index
      %c0_9 = arith.constant 0 : index
      %12 = vector.load %arg7[%c0_8, %c0_9] : memref<16x128xf32, #tpu.memory_space<vmem>>, vector<16x128xf32>
      %c0_10 = arith.constant 0 : index
      %c0_11 = arith.constant 0 : index
      %13 = vector.load %arg5[%c0_10, %c0_11] : memref<1x128xf32, #tpu.memory_space<vmem>>, vector<1x128xf32>
      %14 = vector.broadcast %13 : vector<1x128xf32> to vector<16x128xf32>
      %15 = arith.addf %12, %14 : vector<16x128xf32>
      %c0_12 = arith.constant 0 : index
      %c0_13 = arith.constant 0 : index
      %16 = vector.load %arg6[%c0_12, %c0_13] : memref<16x128xf32, #tpu.memory_space<vmem>>, vector<16x128xf32>
      tpu.vector_store %arg6[%c0_12, %c0_13], %15 {strides = array<i32>} : memref<16x128xf32, #tpu.memory_space<vmem>>, vector<16x128xf32>,
    } else {
    }
    return
  }
  func.func @transform_0(%arg0: i32, %arg1: i32, %arg2: i32) -> (i32, i32) {
    %c0_i32 = arith.constant 0 : i32
    return %arg0, %arg2 : i32, i32
  }
  func.func @transform_1(%arg0: i32, %arg1: i32, %arg2: i32) -> (i32, i32) {
    %c0_i32 = arith.constant 0 : i32
    return %arg2, %arg1 : i32, i32
  }
  func.func @transform_2(%arg0: i32, %arg1: i32, %arg2: i32) -> (i32, i32) {
    %c0_i32 = arith.constant 0 : i32
    %c0_i32_0 = arith.constant 0 : i32
    return %c0_i32, %arg1 : i32, i32
  }
  func.func @transform_3(%arg0: i32, %arg1: i32, %arg2: i32) -> (i32, i32) {
    %c0_i32 = arith.constant 0 : i32
    return %arg0, %arg1 : i32, i32
  }
}

</mosaic_0001>

<bundles_post_ra>
// kernel: dense_forward.1
= control target key start
LH: loop header
LB: loop body
LE: loop exit
PB: predicated region body
PF: predicated region fallthrough
CT: control target
= control target key end

     0   :  { %v214_v0 = vmov 0.0   ;;  %vm215_vm0 = vmmov 0   ;;  %s272_s1 = inlined_call_operand.vmem [shape: bf16[128,128], index: 1, kind: input, shape index: {}]   ;;  %s273_s0 = inlined_call_operand.vmem [shape: bf16[16,128], index: 0, kind: input, shape index: {}]   ;;  %s274_s2 = inlined_call_operand.vmem [shape: f32[1,128], index: 2, kind: input, shape index: {}]   ;;  %s275_s3 = inlined_call_operand.vmem [shape: f32[16,128], index: 3, kind: output, shape index: {}]  }
   0x1   :  { %183 = vmatprep.subr.bf16.mxu0 %v214_v0  ;;  %v205_v1 = vld [vmem:[%s272_s1] sm:$0xff]   ;;  %199 = vmatprep.mubr.msk.bf16.mxu0 %vm215_vm0, %v214_v0  ;;  %v206_v2 = vld [vmem:[%s272_s1 + $0x8] sm:$0xff]   ;;  %v207_v3 = vld [vmem:[%s272_s1 + $0x10] sm:$0xff]  }
   0x2   :  { %184 = vmatpush3.bf16.msra.mxu0 %v205_v1  ;;  %v208_v4 = vld [vmem:[%s272_s1 + $0x18] sm:$0xff]   ;;  %v209_v5 = vld [vmem:[%s272_s1 + $0x20] sm:$0xff]   ;;  %v210_v6 = vld [vmem:[%s272_s1 + $0x28] sm:$0xff]  }
   0x3   :  { %185 = vmatprep.subr.bf16.mxu0 %v214_v0  ;;  %v211_v7 = vld [vmem:[%s272_s1 + $0x30] sm:$0xff]   ;;  %v212_v8 = vld [vmem:[%s272_s1 + $0x38] sm:$0xff]   ;;  %v213_v9 = vld [vmem:[%s273_s0] sm:$0xff]  }
   0x4   :  { %v173_v10 = vld [vmem:[%s274_s2] ss:$0 sm:$0xff] }
   0x6   :  { %186 = vmatpush3.bf16.msra.mxu0 %v206_v2 }
   0x7   :  { %187 = vmatprep.subr.bf16.mxu0 %v214_v0 }
   0xa   :  { %188 = vmatpush3.bf16.msra.mxu0 %v207_v3 }
   0xb   :  { %189 = vmatprep.subr.bf16.mxu0 %v214_v0 }
   0xe   :  { %190 = vmatpush3.bf16.msra.mxu0 %v208_v4 }
   0xf   :  { %191 = vmatprep.subr.bf16.mxu0 %v214_v0 }
  0x12   :  { %192 = vmatpush3.bf16.msra.mxu0 %v209_v5 }
  0x13   :  { %193 = vmatprep.subr.bf16.mxu0 %v214_v0 }
  0x16   :  { %194 = vmatpush3.bf16.msra.mxu0 %v210_v6 }
  0x17   :  { %195 = vmatprep.subr.bf16.mxu0 %v214_v0 }
  0x1a   :  { %196 = vmatpush3.bf16.msra.mxu0 %v211_v7 }
  0x1b   :  { %197 = vmatprep.subr.bf16.mxu0 %v214_v0 }
  0x1e   :  { %198 = vmatpush3.bf16.msra.mxu0 %v212_v8 }
  0x21   :  { %200 = vmatmul.mubr.bf16.vlgmr.msra.gmra.mrb[0].mxu0 %v213_v9 }
  0xf4   :  { %v121_v11 = vpop.f32.mrb[0].mxu0 }
  0xf5   :  { %v156_v12 = vadd.f32 %v173_v10, %v121_v11  ;;  %v201_v13 = vpop.f32.mrb[1].mxu0 }
  0xf6   :  { %v124_v14 = vpop.f32.mrb[2].mxu0 }
  0xf7   :  { %158 = vst [vmem:[%s275_s3] sm:$0xff] %v156_v12  ;;  %v157_v15 = vadd.f32 %v173_v10, %v124_v14  ;;  %v202_v16 = vpop.f32.mrb[3].mxu0 }
  0xf9   :  { %159 = vst [vmem:[%s275_s3 + $0x8] sm:$0xff] %v157_v15 }

</bundles_post_ra>
